<compile_context>
chip_gen: v6e
topology: v6e:2x2x1
jax: 0.10.0
libtpu: 0.0.40
codegen_flags: <defaults>
</compile_context>

<pallas_src>
import functools
import math

import jax
import jax.numpy as jnp
from jax.experimental import pallas as pl
from jax.experimental.pallas import tpu as pltpu


def _round_up(x, m):
    return (x + m - 1) // m * m


# ---------------------------------------------------------------------------
# Fused FFN kernel: relu(x @ W1 + b1) @ W2 + b2
# ---------------------------------------------------------------------------


def _ffn_kernel(x_ref, w1_ref, b1_ref, w2_ref, b2_ref, o_ref):
    # x tile: (tm, E) bf16; W1: (E, H) bf16; W2: (H, E) bf16; biases f32.
    h = jnp.dot(x_ref[...], w1_ref[...],
                preferred_element_type=jnp.float32) + b1_ref[...]
    h = jnp.maximum(h, 0.0)                       # ReLU in f32 (v5e-safe)
    y = jnp.dot(h.astype(w2_ref.dtype), w2_ref[...],
                preferred_element_type=jnp.float32) + b2_ref[...]
    # TODO(synk): nn.Dropout is identity in eval mode; no dropout mask applied.
    o_ref[...] = y.astype(o_ref.dtype)


def prepare_ffn_params(w1, b1, w2, b2, *, compute_dtype=jnp.bfloat16):
    """One-time weight re-layout: PyTorch [out_f, in_f] -> [in_f, out_f]."""
    return {
        "w1_t": jnp.asarray(w1).T.astype(compute_dtype),          # (E, H)
        "b1": jnp.asarray(b1).reshape(1, -1).astype(jnp.float32),  # (1, H)
        "w2_t": jnp.asarray(w2).T.astype(compute_dtype),          # (H, E)
        "b2": jnp.asarray(b2).reshape(1, -1).astype(jnp.float32),  # (1, E)
    }


def feed_forward(params, x, *, tile_m=1024, out_dtype=jnp.bfloat16):
    """Apply the fused FFN.  x: (..., E) -> (..., E) in out_dtype."""
    if tile_m <= 0 or tile_m % 16 != 0:
        raise ValueError(f"tile_m must be a positive multiple of 16, got {tile_m}")

    orig_shape = x.shape
    E = orig_shape[-1]
    H = params["w1_t"].shape[1]
    compute_dtype = params["w1_t"].dtype

    # Single fused reshape+cast; no extra HBM pass if x is already bf16.
    x2d = x.reshape(-1, E).astype(compute_dtype)
    M = x2d.shape[0]

    # Small-M heuristic: keep >= ~16 grid steps (>= ~8 per TC on v7x megacore)
    # so the pipeline overlaps DMA with MXU work; always a multiple of 16.
    tm = min(tile_m, max(16, _round_up(pl.cdiv(M, 16), 16)))
    grid_m = pl.cdiv(M, tm)   # ragged last block handled by Pallas masking

    itm = jnp.dtype(compute_dtype).itemsize
    cost = pl.CostEstimate(
        flops=4 * M * E * H,                      # two matmuls, 2*M*E*H each
        transcendentals=0,
        bytes_accessed=(M * E * itm                               # x in
                        + (E * H + H * E) * itm                   # weights
                        + (H + E) * 4                             # biases
                        + M * E * jnp.dtype(out_dtype).itemsize), # y out
    )

    out = pl.pallas_call(
        _ffn_kernel,
        out_shape=jax.ShapeDtypeStruct((M, E), out_dtype),
        grid=(grid_m,),
        in_specs=[
            pl.BlockSpec((tm, E), lambda i: (i, 0)),   # x tile (pipelined)
            pl.BlockSpec((E, H), lambda i: (0, 0)),    # W1^T, VMEM-resident
            pl.BlockSpec((1, H), lambda i: (0, 0)),    # b1
            pl.BlockSpec((H, E), lambda i: (0, 0)),    # W2^T, VMEM-resident
            pl.BlockSpec((1, E), lambda i: (0, 0)),    # b2
        ],
        out_specs=pl.BlockSpec((tm, E), lambda i: (i, 0)),
        compiler_params=pltpu.CompilerParams(
            dimension_semantics=("parallel",)),        # shard M across TCs (v7x)
        cost_estimate=cost,
    )(x2d, params["w1_t"], params["b1"], params["w2_t"], params["b2"])

    return out.reshape(orig_shape)


# ---------------------------------------------------------------------------
# Reference + deterministic init (PyTorch nn.Linear default init)
# ---------------------------------------------------------------------------


def _init_linear(key, out_f, in_f):
    kw, kb = jax.random.split(key)
    bound = 1.0 / math.sqrt(in_f)
    w = jax.random.uniform(kw, (out_f, in_f), jnp.float32, -bound, bound)
    b = jax.random.uniform(kb, (out_f,), jnp.float32, -bound, bound)
    return w, b


def feed_forward_ref(w1, b1, w2, b2, x2d):
    h = jnp.maximum(x2d @ w1.T + b1, 0.0)
    return h @ w2.T + b2


# ---------------------------------------------------------------------------


if __name__ == "__main__":
    embed_size, hidden_dim, dropout = 128, 512, 0.1   # dropout unused (eval mode)
    B, S = 4, 128                                     # M = B*S = 512 rows

    key = jax.random.PRNGKey(0)
    k1, k2, kx = jax.random.split(key, 3)
    w1, b1 = _init_linear(k1, hidden_dim, embed_size)  # PyTorch layout (H, E)
    w2, b2 = _init_linear(k2, embed_size, hidden_dim)  # PyTorch layout (E, H)
    x = jax.random.normal(kx, (B, S, embed_size), jnp.float32)

    params = prepare_ffn_params(w1, b1, w2, b2, compute_dtype=jnp.bfloat16)
    ffn = jax.jit(functools.partial(feed_forward, tile_m=1024,
                                    out_dtype=jnp.bfloat16))
    y = jax.block_until_ready(ffn(params, x))

    assert y.shape == (B, S, embed_size), y.shape
    assert y.dtype == jnp.bfloat16, y.dtype
    yf = y.astype(jnp.float32)
    assert bool(jnp.all(jnp.isfinite(yf)))

    # Sanity check vs plain-JAX f32 reference (bf16 MXU inputs + bf16 output
    # -> expect ~1e-2 relative error; tolerance set accordingly).
    ref = feed_forward_ref(w1, b1, w2, b2, x.reshape(-1, embed_size)).reshape(x.shape)
    assert bool(jnp.all(jnp.abs(yf - ref) <= 3e-2 + 3e-2 * jnp.abs(ref))), float(
        jnp.max(jnp.abs(yf - ref))
    )

    print("KERNEL_OK")
</pallas_src>

<mosaic_0001>
module attributes {stable_mosaic.version = 11 : i64} {
  func.func @_ffn_kernel(%arg0: i32, %arg1: memref<32x128xbf16, #tpu.memory_space<vmem>>, %arg2: memref<128x512xbf16, #tpu.memory_space<vmem>>, %arg3: memref<1x512xf32, #tpu.memory_space<vmem>>, %arg4: memref<512x128xbf16, #tpu.memory_space<vmem>>, %arg5: memref<1x128xf32, #tpu.memory_space<vmem>>, %arg6: memref<32x128xbf16, #tpu.memory_space<vmem>>) attributes {dimension_semantics = [#tpu.dimension_semantics<parallel>], iteration_bounds = array<i64: 16>, scalar_prefetch = 0 : i64, scratch_operands = 0 : i64, tpu.core_type = #tpu.core_type<tc>, window_params = [{transform_indices = @transform_0, window_bounds = array<i64: 32, 128>}, {pipeline_mode = #tpu.pipeline_mode<synchronous>, transform_indices = @transform_1, window_bounds = array<i64: 128, 512>}, {pipeline_mode = #tpu.pipeline_mode<synchronous>, transform_indices = @transform_2, window_bounds = array<i64: 1, 512>}, {pipeline_mode = #tpu.pipeline_mode<synchronous>, transform_indices = @transform_3, window_bounds = array<i64: 512, 128>}, {pipeline_mode = #tpu.pipeline_mode<synchronous>, transform_indices = @transform_4, window_bounds = array<i64: 1, 128>}, {transform_indices = @transform_5, window_bounds = array<i64: 32, 128>}]} {
    %c0 = arith.constant 0 : index
    %c0_0 = arith.constant 0 : index
    %0 = vector.load %arg1[%c0, %c0_0] : memref<32x128xbf16, #tpu.memory_space<vmem>>, vector<32x128xbf16>
    %c0_1 = arith.constant 0 : index
    %c0_2 = arith.constant 0 : index
    %1 = vector.load %arg2[%c0_1, %c0_2] : memref<128x512xbf16, #tpu.memory_space<vmem>>, vector<128x512xbf16>
    %cst = arith.constant dense<0.000000e+00> : vector<32x512xf32>
    %2 = tpu.matmul %0, %1, %cst {dimension_numbers = #tpu.dot_dimension_numbers<[1], [0], [0], [1], [0, 0, 1, 1], [], []>} : vector<32x128xbf16>, vector<128x512xbf16>, vector<32x512xf32> -> vector<32x512xf32>
    %c0_3 = arith.constant 0 : index
    %c0_4 = arith.constant 0 : index
    %3 = vector.load %arg3[%c0_3, %c0_4] : memref<1x512xf32, #tpu.memory_space<vmem>>, vector<1x512xf32>
    %4 = vector.broadcast %3 : vector<1x512xf32> to vector<32x512xf32>
    %5 = arith.addf %2, %4 : vector<32x512xf32>
    %cst_5 = arith.constant 0.000000e+00 : f32
    %6 = vector.broadcast %cst_5 : f32 to vector<32x512xf32>
    %7 = arith.maximumf %5, %6 : vector<32x512xf32>
    %8 = arith.truncf %7 : vector<32x512xf32> to vector<32x512xbf16>
    %c0_6 = arith.constant 0 : index
    %c0_7 = arith.constant 0 : index
    %9 = vector.load %arg4[%c0_6, %c0_7] : memref<512x128xbf16, #tpu.memory_space<vmem>>, vector<512x128xbf16>
    %cst_8 = arith.constant dense<0.000000e+00> : vector<32x128xf32>
    %10 = tpu.matmul %8, %9, %cst_8 {dimension_numbers = #tpu.dot_dimension_numbers<[1], [0], [0], [1], [0, 0, 1, 1], [], []>} : vector<32x512xbf16>, vector<512x128xbf16>, vector<32x128xf32> -> vector<32x128xf32>
    %c0_9 = arith.constant 0 : index
    %c0_10 = arith.constant 0 : index
    %11 = vector.load %arg5[%c0_9, %c0_10] : memref<1x128xf32, #tpu.memory_space<vmem>>, vector<1x128xf32>
    %12 = vector.broadcast %11 : vector<1x128xf32> to vector<32x128xf32>
    %13 = arith.addf %10, %12 : vector<32x128xf32>
    %14 = arith.truncf %13 : vector<32x128xf32> to vector<32x128xbf16>
    %c0_11 = arith.constant 0 : index
    %c0_12 = arith.constant 0 : index
    %15 = vector.load %arg6[%c0_11, %c0_12] : memref<32x128xbf16, #tpu.memory_space<vmem>>, vector<32x128xbf16>
    tpu.vector_store %arg6[%c0_11, %c0_12], %14 {strides = array<i32>} : memref<32x128xbf16, #tpu.memory_space<vmem>>, vector<32x128xbf16>,
    return
  }
  func.func @transform_0(%arg0: i32) -> (i32, i32) {
    %c0_i32 = arith.constant 0 : i32
    %c0_i32_0 = arith.constant 0 : i32
    return %arg0, %c0_i32 : i32, i32
  }
  func.func @transform_1(%arg0: i32) -> (i32, i32) {
    %c0_i32 = arith.constant 0 : i32
    %c0_i32_0 = arith.constant 0 : i32
    %c0_i32_1 = arith.constant 0 : i32
    return %c0_i32, %c0_i32_0 : i32, i32
  }
  func.func @transform_2(%arg0: i32) -> (i32, i32) {
    %c0_i32 = arith.constant 0 : i32
    %c0_i32_0 = arith.constant 0 : i32
    %c0_i32_1 = arith.constant 0 : i32
    return %c0_i32, %c0_i32_0 : i32, i32
  }
  func.func @transform_3(%arg0: i32) -> (i32, i32) {
    %c0_i32 = arith.constant 0 : i32
    %c0_i32_0 = arith.constant 0 : i32
    %c0_i32_1 = arith.constant 0 : i32
    return %c0_i32, %c0_i32_0 : i32, i32
  }
  func.func @transform_4(%arg0: i32) -> (i32, i32) {
    %c0_i32 = arith.constant 0 : i32
    %c0_i32_0 = arith.constant 0 : i32
    %c0_i32_1 = arith.constant 0 : i32
    return %c0_i32, %c0_i32_0 : i32, i32
  }
  func.func @transform_5(%arg0: i32) -> (i32, i32) {
    %c0_i32 = arith.constant 0 : i32
    %c0_i32_0 = arith.constant 0 : i32
    return %arg0, %c0_i32 : i32, i32
  }
}

</mosaic_0001>

<bundles_post_ra>
// kernel: feed_forward.1
= control target key start
LH: loop header
LB: loop body
LE: loop exit
PB: predicated region body
PF: predicated region fallthrough
CT: control target
= control target key end

     0   :  { %10 = vsyncpa [#allocation3], 0  ;;  %s1730_s0 = inlined_call_operand.vmem [shape: bf16[512,128], index: 0, kind: input, shape index: {}]   ;;  %s1731_s1 = inlined_call_operand.vmem [shape: bf16[128,512], index: 1, kind: input, shape index: {}]   ;;  %s1732_s2 = inlined_call_operand.vmem [shape: f32[1,512], index: 2, kind: input, shape index: {}]   ;;  %s1733_s3 = inlined_call_operand.vmem [shape: bf16[512,128], index: 3, kind: input, shape index: {}]   ;;  %s1734_s4 = inlined_call_operand.vmem [shape: f32[1,128], index: 4, kind: input, shape index: {}]   ;;  %s1735_s5 = inlined_call_operand.hbm [shape: bf16[512,128], index: 5, kind: output, shape index: {}]  }
   0x1   :  { %12 = vsyncpa [#allocation3 + $0x1], 0  ;;  %s1419_s18 = smov 0   ;;  %s1421_s19 = smov 0  }
   0x2   :  { %s1423_s20 = smov 0   ;;  %s1425_s21 = smov 0  }
   0x3 LB: > { %s1440_s22 = sadd.s32 4294967295, %s1383_s21   ;;  %s1044_s23 = sadd.s32 4294967294, %s1383_s21   ;;  %s1383_s21 = sphi %s1425_s21, %s1741_s21   ;;  %s1379_s20 = sphi %s1423_s20, %s1740_s20   ;;  %s1375_s19 = sphi %s1421_s19, %s1739_s19   ;;  %s1371_s18 = sphi %s1419_s18, %s1738_s18  }
   0x4   : > { %s1444_s24 = sadd.s32 1, %s1383_s21   ;;  %s135_s25 = sadd.s32 1, %s1379_s20 }
   0x5   : > { %s132_s26 = ssub.s32 %s1383_s21, %s1444_s24  ;;  %p145_p0 = scmp.ne.s32.totalorder %s1379_s20, %s1375_s19 }
   0x6   : > { %p133_p1 = scmp.eq.s32.totalorder %s132_s26, 0  ;;  %p146_p2 = scmp.eq.s32.totalorder %s1440_s22, 15 }
   0x7   : > { %p151_p3 = scmp.ne.s32.totalorder %s1375_s19, %s1371_s18  ;;  %p152_p4 = scmp.eq.s32.totalorder %s1044_s23, 15 }
   0x8   : > { %s1455_s27 = scalar_select %p133_p1, %s1379_s20, %s135_s25  }
   0x9   : > { %p1457_p5 = por %p146_p2, %p145_p0  ;;  %p1461_p6 = por %p152_p4, %p151_p3 }
   0xa   : > { %p1047_p7 = scmp.ge.s32.totalorder %s1383_s21, 1  ;;  %p191_p8 = scmp.lt.s32.totalorder %s1383_s21, 17 }
   0xc   : > { %p192_p9 = pnand %p1047_p7, %p191_p8 }
   0xd   : > { %s1049_s7 = sshll.u32 (!%p192_p9), %s1440_s22, 2  ;;  %s216_s17 = sand.u32 (!%p192_p9), 1, %s1375_s19  }
   0xe   : > { %195 = sbr.rel (%p192_p9) target bundleno = 488 (0x1e8), region = 40  ;;  %p220_p10 = scmp.lt.s32.totalorder (!%p192_p9), %s1049_s7, 63 }
   0xf   : > { %s1048_s23 = sshll.u32 (!%p192_p9), %s216_s17, 4  ;;  %s1690_s9 = scalar_lea.sflag (!%p192_p9), [#allocation3], %s216_s17 }
  0x10   : > { %s218_s26 = scalar_lea.vmem (!%p192_p9), [#allocation2], %s1048_s23 }
  0x13   : > { %v1241_v0 = vld [vmem:[%s1731_s1 + $0xe4] ss:$16 sps:$4 sm:$0xff]   ;;  %v1243_v1 = vld [vmem:[%s1731_s1 + $0xec] ss:$16 sps:$4 sm:$0xff]   ;;  %v1385_v2 = vmov 0   ;;  %s1743_s7 = smov (!%p220_p10, %s1049_s7), 63 }
  0x14   : > { %489 = vmatprep.mubr.bf16.mxu0 %v1385_v2  ;;  %542 = vmatprep.mubr.bf16.mxu1 %v1385_v2  ;;  %v1245_v3 = vld [vmem:[%s1731_s1 + $0xe0] ss:$16 sps:$4 sm:$0xff]   ;;  %v1246_v4 = vld [vmem:[%s1731_s1 + $0xe8] ss:$16 sps:$4 sm:$0xff]   ;;  %v1247_v5 = vld [vmem:[%s1731_s1 + $0xc4] ss:$16 sps:$4 sm:$0xff]  }
  0x15   : > { %457 = vmatprep.subr.bf16.mxu0 %v1241_v0  ;;  %510 = vmatprep.subr.bf16.mxu1 %v1243_v1  ;;  %v1249_v6 = vld [vmem:[%s1731_s1 + $0xcc] ss:$16 sps:$4 sm:$0xff]   ;;  %v1251_v7 = vld [vmem:[%s1731_s1 + $0xc0] ss:$16 sps:$4 sm:$0xff]   ;;  %v1252_v8 = vld [vmem:[%s1731_s1 + $0xc8] ss:$16 sps:$4 sm:$0xff]  }
  0x16   : > { %458 = vmatpush1.bf16.msra.mxu0 %v1245_v3  ;;  %511 = vmatpush1.bf16.msra.mxu1 %v1246_v4  ;;  %v1253_v9 = vld [vmem:[%s1731_s1 + $0xa4] ss:$16 sps:$4 sm:$0xff]   ;;  %v1255_v10 = vld [vmem:[%s1731_s1 + $0xac] ss:$16 sps:$4 sm:$0xff]   ;;  %v1257_v11 = vld [vmem:[%s1731_s1 + $0xa0] ss:$16 sps:$4 sm:$0xff]   ;;  %v265_v3 = vlaneseq }
  0x17   : > { %459 = vmatprep.subr.bf16.mxu0 %v1247_v5  ;;  %512 = vmatprep.subr.bf16.mxu1 %v1249_v6  ;;  %v1258_v12 = vld [vmem:[%s1731_s1 + $0xa8] ss:$16 sps:$4 sm:$0xff]   ;;  %v1259_v13 = vld [vmem:[%s1731_s1 + $0x84] ss:$16 sps:$4 sm:$0xff]   ;;  %v1261_v14 = vld [vmem:[%s1731_s1 + $0x8c] ss:$16 sps:$4 sm:$0xff]  }
  0x18   : > { %v1263_v15 = vld [vmem:[%s1731_s1 + $0x80] ss:$16 sps:$4 sm:$0xff]   ;;  %v1264_v16 = vld [vmem:[%s1731_s1 + $0x88] ss:$16 sps:$4 sm:$0xff]   ;;  %v1265_v17 = vld [vmem:[%s1731_s1 + $0x64] ss:$16 sps:$4 sm:$0xff]  }
  0x19   : > { %v1267_v18 = vld [vmem:[%s1731_s1 + $0x6c] ss:$16 sps:$4 sm:$0xff]   ;;  %v1269_v19 = vld [vmem:[%s1731_s1 + $0x60] ss:$16 sps:$4 sm:$0xff]   ;;  %v1270_v20 = vld [vmem:[%s1731_s1 + $0x68] ss:$16 sps:$4 sm:$0xff]  }
  0x1a   : > { %460 = vmatpush1.bf16.msra.mxu0 %v1251_v7  ;;  %513 = vmatpush1.bf16.msra.mxu1 %v1252_v8  ;;  %v1271_v21 = vld [vmem:[%s1731_s1 + $0x44] ss:$16 sps:$4 sm:$0xff]   ;;  %v1273_v22 = vld [vmem:[%s1731_s1 + $0x4c] ss:$16 sps:$4 sm:$0xff]   ;;  %s1050_s25 = sshll.u32 %s1743_s7, 2  ;;  %v266_v4 = vshrl.u32 %v265_v3, 7 }
  0x1b   : > { %461 = vmatprep.subr.bf16.mxu0 %v1253_v9  ;;  %514 = vmatprep.subr.bf16.mxu1 %v1255_v10  ;;  %v1275_v23 = vld [vmem:[%s1731_s1 + $0x40] ss:$16 sps:$4 sm:$0xff]   ;;  %v1276_v24 = vld [vmem:[%s1731_s1 + $0x48] ss:$16 sps:$4 sm:$0xff]   ;;  %v1277_v25 = vld [vmem:[%s1731_s1 + $0x24] ss:$16 sps:$4 sm:$0xff]   ;;  %s1548_s13 = scalar_lea.vmem %s1730_s0, %s1050_s25 }
  0x1c   : > { %v1279_v26 = vld [vmem:[%s1731_s1 + $0x2c] ss:$16 sps:$4 sm:$0xff]   ;;  %v1281_v27 = vld [vmem:[%s1731_s1 + $0x20] ss:$16 sps:$4 sm:$0xff]   ;;  %v1282_v28 = vld [vmem:[%s1731_s1 + $0x28] ss:$16 sps:$4 sm:$0xff]  }
  0x1d   : > { %v1283_v29 = vld [vmem:[%s1731_s1 + $0x4] ss:$16 sps:$4 sm:$0xff]   ;;  %v1285_v30 = vld [vmem:[%s1731_s1 + $0xc] ss:$16 sps:$4 sm:$0xff]   ;;  %v1287_v31 = vld [vmem:[%s1731_s1] ss:$16 sps:$4 sm:$0xff]  }
  0x1e   : > { %462 = vmatpush1.bf16.msra.mxu0 %v1257_v11  ;;  %515 = vmatpush1.bf16.msra.mxu1 %v1258_v12  ;;  %v1288_v32 = vld [vmem:[%s1731_s1 + $0x8] ss:$16 sps:$4 sm:$0xff]   ;;  %v1289_v35 = vld [vmem:[%s1548_s13] sm:$0xff]   ;;  %v1295_v38 = vld [vmem:[%s1733_s3 + $0x70] sm:$0xff]   ;;  %v271_v5 = vsub.s32 1, %v266_v4  ;;  %v279_v6 = vsub.s32 3, %v266_v4 }
  0x1f   : > { %463 = vmatprep.subr.bf16.mxu0 %v1259_v13  ;;  %516 = vmatprep.subr.bf16.mxu1 %v1261_v14  ;;  %v1291_v33 = vld [vmem:[%s1733_s3 + $0x78] sm:$0xff]   ;;  %v1296_v39 = vld [vmem:[%s1733_s3 + $0xf0] sm:$0xff]   ;;  %v1290_v42 = vld [vmem:[%s1548_s13 + $0x8] sm:$0xff]   ;;  %v267_v7 = vsub.s32 0, %v266_v4  ;;  %v275_v8 = vsub.s32 2, %v266_v4  ;;  %s982_s25 = sshll.u32 %s218_s26, 4  ;;  %s1681_s25 = int_to_ptr.vmem [resolvable:$true] %s982_s25 }
  0x20   : > { %v1292_v34 = vld [vmem:[%s1733_s3 + $0xf8] sm:$0xff]   ;;  %v1297_v40 = vld [vmem:[%s1733_s3 + $0x30] sm:$0xff]   ;;  %v1299_v43 = vld [vmem:[%s1733_s3 + $0x68] sm:$0xff]   ;;  %s1131_s13 = sshll.u32 %s1440_s22, 8  ;;  %s1323_s10 = scalar_lea.vmem %s1681_s25, 256 }
  0x21   : > { %v1293_v36 = vld [vmem:[%s1733_s3 + $0x38] sm:$0xff]   ;;  %v1298_v41 = vld [vmem:[%s1733_s3 + $0xb0] sm:$0xff]   ;;  %v1300_v44 = vld [vmem:[%s1733_s3 + $0xe8] sm:$0xff]   ;;  %s1686_s8 = scalar_lea.hbm %s1735_s5, %s1131_s13  ;;  %p1324_p11 = scmp.ne.s32.totalorder %s1681_s25, %s1323_s10 }
  0x22   : > { %464 = vmatpush1.bf16.msra.mxu0 %v1263_v15  ;;  %517 = vmatpush1.bf16.msra.mxu1 %v1264_v16  ;;  %v1294_v37 = vld [vmem:[%s1733_s3 + $0xb8] sm:$0xff]   ;;  %v1301_v45 = vld [vmem:[%s1733_s3 + $0x28] sm:$0xff]   ;;  %v1303_v47 = vld [vmem:[%s1733_s3 + $0x60] sm:$0xff]   ;;  %s1386_s22 = smov [#allocation2]  }
  0x23   : > { %465 = vmatprep.subr.bf16.mxu0 %v1265_v17  ;;  %518 = vmatprep.subr.bf16.mxu1 %v1267_v18  ;;  %v1302_v46 = vld [vmem:[%s1733_s3 + $0xa8] sm:$0xff]   ;;  %v1304_v48 = vld [vmem:[%s1733_s3 + $0xe0] sm:$0xff]   ;;  %v1307_v51 = vld [vmem:[%s1733_s3 + $0x58] sm:$0xff]   ;;  %p1325_p12 = pnand %p1324_p11, %p1457_p5  ;;  %s1327_s11 = sshll.u32 %s1386_s22, 4  ;;  %s1328_s11 = int_to_ptr.vmem [resolvable:$false] %s1327_s11 }
  0x24   : > { %v1305_v49 = vld [vmem:[%s1733_s3 + $0x20] sm:$0xff]   ;;  %v1308_v52 = vld [vmem:[%s1733_s3 + $0xd8] sm:$0xff]   ;;  %v1311_v55 = vld [vmem:[%s1733_s3 + $0x50] sm:$0xff]   ;;  %s1329_s12 = scalar_lea.vmem %s1328_s11, 512  ;;  %p1330_p0 = scmp.lt.s32.totalorder %s1681_s25, %s1328_s11 }
  0x25   : > { %v1306_v50 = vld [vmem:[%s1733_s3 + $0xa0] sm:$0xff]   ;;  %v1309_v53 = vld [vmem:[%s1733_s3 + $0x18] sm:$0xff]   ;;  %v1312_v56 = vld [vmem:[%s1733_s3 + $0xd0] sm:$0xff]   ;;  %p1326_p13 = pneg %p1325_p12  ;;  %p1331_p1 = scmp.lt.s32.totalorder %s1329_s12, %s1323_s10 }
  0x26   : > { %466 = vmatpush1.bf16.msra.mxu0 %v1269_v19  ;;  %519 = vmatpush1.bf16.msra.mxu1 %v1270_v20  ;;  %v1310_v54 = vld [vmem:[%s1733_s3 + $0x98] sm:$0xff]   ;;  %v1313_v57 = vld [vmem:[%s1733_s3 + $0x10] sm:$0xff]   ;;  %v1315_v59 = vld [vmem:[%s1733_s3 + $0x48] sm:$0xff]  }
  0x27   : > { %467 = vmatprep.subr.bf16.mxu0 %v1271_v21  ;;  %520 = vmatprep.subr.bf16.mxu1 %v1273_v22  ;;  %v1314_v58 = vld [vmem:[%s1733_s3 + $0x90] sm:$0xff]   ;;  %v1316_v60 = vld [vmem:[%s1733_s3 + $0xc8] sm:$0xff]   ;;  %v1319_v63 = vld [vmem:[%s1733_s3 + $0x40] sm:$0xff]   ;;  %p1332_p2 = por %p1331_p1, %p1330_p0 }
  0x28   : > { %v1317_v61 = vld [vmem:[%s1733_s3 + $0x8] sm:$0xff]   ;;  %v1320_v0 = vld [vmem:[%s1733_s3 + $0xc0] sm:$0xff]  }
  0x29   : > { %v1318_v62 = vld [vmem:[%s1733_s3 + $0x88] sm:$0xff]   ;;  %v1321_v1 = vld [vmem:[%s1733_s3] sm:$0xff]   ;;  %p1333_p3 = pnand %p1332_p2, %p1326_p13 }
  0x2a   : > { %468 = vmatpush1.bf16.msra.mxu0 %v1275_v23  ;;  %521 = vmatpush1.bf16.msra.mxu1 %v1276_v24  ;;  %v263_v9 = vld [vmem:[%s1732_s2] sm:$0xf] }
  0x2b   : > { %469 = vmatprep.subr.bf16.mxu0 %v1277_v25  ;;  %522 = vmatprep.subr.bf16.mxu1 %v1279_v26  ;;  %v272_v12 = vrot.slane %v263_v9, %v271_v5  ;;  %v280_v13 = vrot.slane %v263_v9, %v279_v6  ;;  %v268_v14 = vrot.slane %v263_v9, %v267_v7 }
  0x2c   : > { %v276_v15 = vrot.slane %v263_v9, %v275_v8 }
  0x2e   : > { %470 = vmatpush1.bf16.msra.mxu0 %v1281_v27  ;;  %523 = vmatpush1.bf16.msra.mxu1 %v1282_v28 }
  0x2f   : > { %471 = vmatprep.subr.bf16.mxu0 %v1283_v29  ;;  %524 = vmatprep.subr.bf16.mxu1 %v1285_v30 }
  0x32   : > { %472 = vmatpush1.bf16.msra.mxu0 %v1287_v31  ;;  %525 = vmatpush1.bf16.msra.mxu1 %v1288_v32 }
  0x33   : > { %1143 = vmatprep.subr.bf16.mxu0 %v1291_v33  ;;  %1171 = vmatprep.subr.bf16.mxu1 %v1292_v34 }
  0x35   : > { %490 = vmatmul.mubr.bf16.vlgmr.msra.gmra.mxu0 %v1289_v35  ;;  %543 = vmatmul.mubr.bf16.vlgmr.msra.gmra.mxu1 %v1289_v35 }
  0x36   : > { %499 = vmatprep.mubr.bf16.mxu0 %v1385_v2  ;;  %552 = vmatprep.mubr.bf16.mxu1 %v1385_v2  ;;  %v1322_v2 = vld [vmem:[%s1733_s3 + $0x80] sm:$0xff]  }
  0x37   : > { %1144 = vmatpush3.bf16.msra.mxu0 %v1293_v36  ;;  %1172 = vmatpush3.bf16.msra.mxu1 %v1294_v37 }
  0x38   : > { %1145 = vmatprep.subr.bf16.mxu0 %v1295_v38  ;;  %1173 = vmatprep.subr.bf16.mxu1 %v1296_v39 }
  0x3b   : > { %1146 = vmatpush3.bf16.msra.mxu0 %v1297_v40  ;;  %1174 = vmatpush3.bf16.msra.mxu1 %v1298_v41 }
  0x3c   : > { %1147 = vmatprep.subr.bf16.mxu0 %v1299_v43  ;;  %1175 = vmatprep.subr.bf16.mxu1 %v1300_v44 }
  0x3d   : > { %500 = vmatmul.mubr.bf16.gmra.mxu0 %v1290_v42  ;;  %553 = vmatmul.mubr.bf16.gmra.mxu1 %v1290_v42 }
  0x3f   : > { %1148 = vmatpush3.bf16.msra.mxu0 %v1301_v45  ;;  %1176 = vmatpush3.bf16.msra.mxu1 %v1302_v46 }
  0x40   : > { %1149 = vmatprep.subr.bf16.mxu0 %v1303_v47  ;;  %1177 = vmatprep.subr.bf16.mxu1 %v1304_v48 }
  0x43   : > { %1150 = vmatpush3.bf16.msra.mxu0 %v1305_v49  ;;  %1178 = vmatpush3.bf16.msra.mxu1 %v1306_v50 }
  0x44   : > { %1151 = vmatprep.subr.bf16.mxu0 %v1307_v51  ;;  %1179 = vmatprep.subr.bf16.mxu1 %v1308_v52 }
  0x47   : > { %1152 = vmatpush3.bf16.msra.mxu0 %v1309_v53  ;;  %1180 = vmatpush3.bf16.msra.mxu1 %v1310_v54 }
  0x48   : > { %1153 = vmatprep.subr.bf16.mxu0 %v1311_v55  ;;  %1181 = vmatprep.subr.bf16.mxu1 %v1312_v56 }
  0x4b   : > { %1154 = vmatpush3.bf16.msra.mxu0 %v1313_v57  ;;  %1182 = vmatpush3.bf16.msra.mxu1 %v1314_v58 }
  0x4c   : > { %1155 = vmatprep.subr.bf16.mxu0 %v1315_v59  ;;  %1183 = vmatprep.subr.bf16.mxu1 %v1316_v60 }
  0x4f   : > { %1156 = vmatpush3.bf16.msra.mxu0 %v1317_v61  ;;  %1184 = vmatpush3.bf16.msra.mxu1 %v1318_v62 }
  0x50   : > { %1157 = vmatprep.subr.bf16.mxu0 %v1319_v63  ;;  %1185 = vmatprep.subr.bf16.mxu1 %v1320_v0 }
  0x53   : > { %1158 = vmatpush3.bf16.msra.mxu0 %v1321_v1  ;;  %1186 = vmatpush3.bf16.msra.mxu1 %v1322_v2 }
  0xf5   : > { %v491_v10 = vpop.f32.mrf.mxu0  ;;  %v544_v11 = vpop.f32.mrf.mxu1 }
  0xf6   : > { %v492_v24 = vadd.f32 %v491_v10, %v268_v14  ;;  %v545_v25 = vadd.f32 %v544_v11, %v276_v15  ;;  %v1085_v11 = vld [vmem:[%s1734_s4] ss:$0 sm:$0xff] }
  0xf7   : > { %v493_v16 = vpop.f32.mrf.mxu0  ;;  %v546_v17 = vpop.f32.mrf.mxu1 }
  0xf8   : > { %v494_v20 = vadd.f32 %v493_v16, %v272_v12  ;;  %v547_v21 = vadd.f32 %v546_v17, %v280_v13  ;;  %v563_v38 = vmax.f32 %v492_v24, 0.0  ;;  %v565_v39 = vmax.f32 %v545_v25, 0.0 }
  0xf9   : > { %v495_v18 = vpop.f32.mrf.mxu0  ;;  %v548_v19 = vpop.f32.mrf.mxu1 }
  0xfa   : > { %v496_v22 = vadd.f32 %v495_v18, %v268_v14  ;;  %v549_v23 = vadd.f32 %v548_v19, %v276_v15  ;;  %v564_v34 = vmax.f32 %v494_v20, 0.0  ;;  %v566_v35 = vmax.f32 %v547_v21, 0.0 }
  0xfb   : > { %v497_v26 = vpop.f32.mrf.mxu0  ;;  %v550_v27 = vpop.f32.mrf.mxu1 }
  0xfc   : > { %v498_v28 = vadd.f32 %v497_v26, %v272_v12  ;;  %v551_v29 = vadd.f32 %v550_v27, %v280_v13  ;;  %v567_v30 = vmax.f32 %v496_v22, 0.0  ;;  %v569_v31 = vmax.f32 %v549_v23, 0.0 }
  0xfd   : > { %v501_v32 = vpop.f32.mrf.mxu0  ;;  %v554_v33 = vpop.f32.mrf.mxu1 }
  0xfe   : > { %v568_v36 = vmax.f32 %v498_v28, 0.0  ;;  %v570_v37 = vmax.f32 %v551_v29, 0.0  ;;  %v579_v44 = vpack.c.bf16 %v567_v30, %v563_v38  ;;  %v581_v45 = vpack.c.bf16 %v569_v31, %v565_v39 }
  0xff   : > { %v503_v40 = vpop.f32.mrf.mxu0  ;;  %v556_v41 = vpop.f32.mrf.mxu1  ;;  %v502_v52 = vadd.f32 %v501_v32, %v268_v14  ;;  %v555_v53 = vadd.f32 %v554_v33, %v276_v15 }
 0x100   : > { %v580_v42 = vpack.c.bf16 %v568_v36, %v564_v34  ;;  %v582_v43 = vpack.c.bf16 %v570_v37, %v566_v35  ;;  %v504_v46 = vadd.f32 %v503_v40, %v272_v12  ;;  %v557_v49 = vadd.f32 %v556_v41, %v280_v13 }
 0x101   : > { %v505_v47 = vpop.f32.mrf.mxu0  ;;  %v558_v48 = vpop.f32.mrf.mxu1  ;;  %v571_v0 = vmax.f32 %v502_v52, 0.0  ;;  %v573_v1 = vmax.f32 %v555_v53, 0.0 }
 0x102   : > { %v506_v50 = vadd.f32 %v505_v47, %v268_v14  ;;  %v559_v51 = vadd.f32 %v558_v48, %v276_v15  ;;  %882 = vmatprep.mubr.bf16.mxu0 %v580_v42  ;;  %931 = vmatprep.mubr.bf16.mxu1 %v582_v43  ;;  %v572_v60 = vmax.f32 %v504_v46, 0.0  ;;  %v574_v61 = vmax.f32 %v557_v49, 0.0 }
 0x103   : > { %v507_v54 = vpop.f32.mrf.mxu0  ;;  %v560_v55 = vpop.f32.mrf.mxu1  ;;  %883 = vmatmul.mubr.bf16.vlgmr.msra.gmra.mxu0 %v579_v44  ;;  %932 = vmatmul.mubr.bf16.vlgmr.msra.gmra.mxu1 %v581_v45 }
 0x104   : > { %v508_v56 = vadd.f32 %v507_v54, %v272_v12  ;;  %v561_v57 = vadd.f32 %v560_v55, %v280_v13  ;;  %v575_v58 = vmax.f32 %v506_v50, 0.0  ;;  %v577_v59 = vmax.f32 %v559_v51, 0.0 }
 0x106   : > { %v576_v62 = vmax.f32 %v508_v56, 0.0  ;;  %v578_v63 = vmax.f32 %v561_v57, 0.0  ;;  %v583_v4 = vpack.c.bf16 %v575_v58, %v571_v0  ;;  %v585_v5 = vpack.c.bf16 %v577_v59, %v573_v1 }
 0x108   : > { %v584_v2 = vpack.c.bf16 %v576_v62, %v572_v60  ;;  %v586_v3 = vpack.c.bf16 %v578_v63, %v574_v61 }
 0x10a   : > { %890 = vmatprep.mubr.bf16.mxu0 %v584_v2  ;;  %939 = vmatprep.mubr.bf16.mxu1 %v586_v3 }
 0x10b   : > { %891 = vmatmul.mubr.bf16.gmra.mxu0 %v583_v4  ;;  %940 = vmatmul.mubr.bf16.gmra.mxu1 %v585_v5 }
 0x1c3   : > { %v1159_v6 = vpop.f32.mrf.mxu0  ;;  %v1187_v7 = vpop.f32.mrf.mxu1 }
 0x1c5   : > { %v1160_v8 = vpop.f32.mrf.mxu0  ;;  %v1188_v9 = vpop.f32.mrf.mxu1 }
 0x1c6   : > { %v1161_v10 = vadd.f32 %v1160_v8, %v1159_v6  ;;  %v1189_v20 = vadd.f32 %v1188_v9, %v1187_v7 }
 0x1c7   : > { %v1162_v12 = vpop.f32.mrf.mxu0  ;;  %v1190_v13 = vpop.f32.mrf.mxu1 }
 0x1c8   : > { %v885_v16 = vadd.f32 %v1161_v10, %v1085_v11 }
 0x1c9   : > { %v1163_v14 = vpop.f32.mrf.mxu0  ;;  %v1191_v15 = vpop.f32.mrf.mxu1 }
 0x1ca   : > { %v1164_v17 = vadd.f32 %v1163_v14, %v1162_v12  ;;  %v1192_v22 = vadd.f32 %v1191_v15, %v1190_v13  ;;  %v934_v25 = vadd.f32 %v1189_v20, %v885_v16 }
 0x1cb   : > { %v1165_v18 = vpop.f32.mrf.mxu0  ;;  %v1193_v19 = vpop.f32.mrf.mxu1 }
 0x1cc   : > { %v888_v21 = vadd.f32 %v1164_v17, %v1085_v11 }
 0x1cd   : > { %v1166_v23 = vpop.f32.mrf.mxu0  ;;  %v1194_v24 = vpop.f32.mrf.mxu1 }
 0x1ce   : > { %v937_v26 = vadd.f32 %v1192_v22, %v888_v21  ;;  %v1167_v27 = vadd.f32 %v1166_v23, %v1165_v18  ;;  %v1195_v35 = vadd.f32 %v1194_v24, %v1193_v19 }
 0x1cf   : > { %v1168_v28 = vpop.f32.mrf.mxu0  ;;  %v1196_v29 = vpop.f32.mrf.mxu1 }
 0x1d0   : > { %v1135_v30 = vpack.c.bf16 %v937_v26, %v934_v25  ;;  %v893_v33 = vadd.f32 %v1167_v27, %v1085_v11 }
 0x1d1   : > { %v1169_v31 = vpop.f32.mrf.mxu0  ;;  %v1197_v32 = vpop.f32.mrf.mxu1 }
 0x1d2   : > { %1136 = vst [vmem:[%s218_s26] sm:$0xff] %v1135_v30   ;;  %v1170_v34 = vadd.f32 %v1169_v31, %v1168_v28  ;;  %v1198_v37 = vadd.f32 %v1197_v32, %v1196_v29  ;;  %v942_v38 = vadd.f32 %v1195_v35, %v893_v33 }
 0x1d4   : > { %v896_v36 = vadd.f32 %v1170_v34, %v1085_v11 }
 0x1d6   : > { %v945_v39 = vadd.f32 %v1198_v37, %v896_v36 }
 0x1d8   : > { %v1140_v40 = vpack.c.bf16 %v945_v39, %v942_v38 }
 0x1da   : > { %1142 = vst [vmem:[%s218_s26 + $0x8] sm:$0xff] %v1140_v40  }
 0x1db   : > { %1336 = shalt.err (!%p1333_p3)
}
 0x1dc   : > { %s1337_s7 = scalar_lea.hbm %s1686_s8, 256  ;;  %s1341_s16 = scalar_lea.hbm %s1735_s5, 4096 }
 0x1dd   : > { %p1338_p4 = scmp.ne.s32.totalorder %s1686_s8, %s1337_s7  ;;  %p1342_p9 = scmp.lt.s32.totalorder %s1686_s8, %s1735_s5 }
 0x1de   : > { %p1343_p10 = scmp.lt.s32.totalorder %s1341_s16, %s1337_s7 }
 0x1df   : > { %p1339_p7 = pnand %p1338_p4, %p1457_p5 }
 0x1e0   : > { %p1344_p11 = por %p1343_p10, %p1342_p9 }
 0x1e1   : > { %p1340_p8 = pneg %p1339_p7 }
 0x1e3   : > { %p1345_p12 = pnand %p1344_p11, %p1340_p8 }
 0x1e5   : > { %1348 = shalt.err (!%p1345_p12)
}
 0x1e6   : > { %s1387_s26 = smov 64   ;;  %s1388_s13 = smov 4  }
 0x1e7   : > { %1199 = dma.vmem_to_hbm [thread:$0]  (%p1457_p5), %s1681_s25, 256, %s1686_s8, %s1690_s9, %s1387_s26, %s1387_s26, %s1388_s13  }
 0x1e8 PF: > { %p1205_p13 = scmp.ge.s32.totalorder %s1383_s21, 2  ;;  %s997_s30 = sand.u32 1, %s1371_s18  }
 0x1e9   : > { %s998_s6 = scalar_lea.sflag [#allocation3], %s997_s30 }
 0x1ea   : > { %p1202_p0 = pnand %p1205_p13, %p1461_p6 }
 0x1ec   : > { %p1203_p1 = pneg %p1202_p0 }
 0x1ee   : > { %1366 = dma.done.wait (%p1203_p1), %s998_s6, 256  }
 0x1ef   : > { %1368 = vsyncadd (%p1203_p1), %s998_s6, 4294967040  ;;  %p15_p2 = scmp.ge.s32.totalorder %s1444_s24, 18   ;;  %s1738_s18 = smov %s1375_s19 }
 0x1f0   : > { %s1739_s19 = smov %s1379_s20  ;;  %s1740_s20 = smov %s1455_s27 }
 0x1f1   : > { %s1741_s21 = smov %s1444_s24  ;;  %17 = sbr.rel (!%p15_p2) target bundleno = 3 (0x3), region = 75 }
 0x1f6   :  { %1003 = vsyncpa [#allocation3], 1 }
 0x1f7   :  { %1005 = vsyncpa [#allocation3 + $0x1], 1 }

</bundles_post_ra>
